<compile_context>
chip_gen: v7x
topology: tpu7x:2x2x1
jax: 0.10.0
libtpu: 0.0.40
codegen_flags: <defaults>
</compile_context>

<pallas_src>
import jax
import jax.numpy as jnp
from jax.experimental import pallas as pl
from jax.experimental.pallas import tpu as pltpu


# --------------------------------- kernel ------------------------------------

def _identity_kernel(x_ref, o_ref):
    # Whole-tile, lane-dense copy: one vld/vst stream per block.
    o_ref[...] = x_ref[...]


# ------------------------------- tiling helpers ------------------------------

_TILE_BYTES_TARGET = 4 << 20  # ~4 MiB per block (per buffer)


def _sublane_multiple(dtype) -> int:
    """Dtype-aware second-to-last-dim alignment: 8 (f32), 16 (bf16), 32 (int8/fp8)."""
    itemsize = jnp.dtype(dtype).itemsize
    return max(8, 32 // max(itemsize, 1))


def _choose_lane_width(total: int):
    """Largest multiple-of-128 lane width (<= 8192) dividing the element count."""
    for lane in (8192, 4096, 2048, 1024, 512, 256, 128):
        if total % lane == 0:
            return lane
    return None


def _choose_row_tile(m: int, lane: int, itemsize: int, sublane: int) -> int:
    """Row tile sized by bytes (~4 MiB), sublane-aligned, bounded by m, and
    split so the grid has >= 2 steps when possible (keeps both v7x TCs busy)."""
    rows = max(sublane, _TILE_BYTES_TARGET // max(lane * itemsize, 1))
    rows = max(sublane, (rows // sublane) * sublane)   # round down to sublane mult
    rows = min(rows, m)
    if rows >= m and m > sublane:
        # Whole array fits in one block: split into (at least) 2 grid steps.
        half = pl.cdiv(m, 2)
        half = ((half + sublane - 1) // sublane) * sublane
        rows = min(rows, half)
    return rows


# --------------------------------- wrapper -----------------------------------

def no_norm_pallas(x, *, force_kernel: bool = False):
    """Pallas implementation of NoNorm.forward: returns x unchanged.

    Fast path (default): identity needs no data movement -> return x directly.
    force_kernel=True runs the explicit Pallas copy kernel (validation / demo).
    """
    if not force_kernel:
        return x  # 0 bytes of HBM traffic — the optimal "kernel".

    if x.ndim == 0 or x.size == 0:
        return x

    total = x.size
    itemsize = jnp.dtype(x.dtype).itemsize
    sublane = _sublane_multiple(x.dtype)

    lane = _choose_lane_width(total)
    if lane is not None:
        # Lane-dense re-tiling: order is irrelevant for an identity, so pick a
        # lane width that is a big multiple of 128 -> unmasked stores.
        m, n = total // lane, lane
    elif x.ndim >= 2:
        # Fall back to the natural (rows, last_dim) view; full last dim is a
        # legal block extent even when it is not a multiple of 128.
        n = x.shape[-1]
        m = total // n
    else:
        # Tiny/awkward 1-D case: single full-array block.
        m, n = 1, total

    x2 = x.reshape(m, n)
    tile_m = _choose_row_tile(m, n, itemsize, sublane)
    grid = (pl.cdiv(m, tile_m),)

    out = pl.pallas_call(
        _identity_kernel,
        out_shape=jax.ShapeDtypeStruct((m, n), x.dtype),
        grid_spec=pltpu.PrefetchScalarGridSpec(
            num_scalar_prefetch=0,
            grid=grid,
            in_specs=[pl.BlockSpec((tile_m, n), lambda i: (i, 0))],
            out_specs=pl.BlockSpec((tile_m, n), lambda i: (i, 0)),
        ),
        compiler_params=pltpu.CompilerParams(
            dimension_semantics=("parallel",),
            vmem_limit_bytes=32 << 20,
        ),
        # Lets XLA reuse the input HBM buffer for the output when the input is
        # donated.  Note: this does NOT avoid the HBM->VMEM->HBM DMA traffic;
        # only the fast path above does that.
        input_output_aliases={0: 0},
    )(x2)
    return out.reshape(x.shape)


# --------------------------------- main --------------------------------------

if __name__ == "__main__":
    key = jax.random.PRNGKey(0)
    # Small (batch, seq, hidden) activation tensor.
    x = jax.random.normal(key, (2, 8, 32), jnp.float32)

    # Exercise the explicit Pallas kernel path.
    out = jax.block_until_ready(no_norm_pallas(x, force_kernel=True))
    assert out.shape == x.shape
    assert out.dtype == x.dtype
    assert bool(jnp.all(out == x)), "kernel path: identity mismatch"

    # Exercise the zero-copy fast path (the recommended production path).
    out_fast = jax.block_until_ready(no_norm_pallas(x))
    assert bool(jnp.all(out_fast == x)), "fast path: identity mismatch"

    print("KERNEL_OK")
</pallas_src>

<mosaic_0001>
module attributes {stable_mosaic.version = 11 : i64} {
  func.func @_identity_kernel(%arg0: i32, %arg1: memref<1x512xf32, #tpu.memory_space<vmem>>, %arg2: memref<1x512xf32, #tpu.memory_space<vmem>>) attributes {dimension_semantics = [#tpu.dimension_semantics<parallel>], iteration_bounds = array<i64: 1>, scalar_prefetch = 0 : i64, scratch_operands = 0 : i64, tpu.core_type = #tpu.core_type<tc>, window_params = [{transform_indices = @transform_0, window_bounds = array<i64: 1, 512>}, {transform_indices = @transform_1, window_bounds = array<i64: 1, 512>}]} {
    %c0 = arith.constant 0 : index
    %c0_0 = arith.constant 0 : index
    %0 = vector.load %arg1[%c0, %c0_0] : memref<1x512xf32, #tpu.memory_space<vmem>>, vector<1x512xf32>
    %c0_1 = arith.constant 0 : index
    %c0_2 = arith.constant 0 : index
    %1 = vector.load %arg2[%c0_1, %c0_2] : memref<1x512xf32, #tpu.memory_space<vmem>>, vector<1x512xf32>
    tpu.vector_store %arg2[%c0_1, %c0_2], %0 {strides = array<i32>} : memref<1x512xf32, #tpu.memory_space<vmem>>, vector<1x512xf32>,
    return
  }
  func.func @transform_0(%arg0: i32) -> (i32, i32) {
    %c0_i32 = arith.constant 0 : i32
    %c0_i32_0 = arith.constant 0 : i32
    return %arg0, %c0_i32 : i32, i32
  }
  func.func @transform_1(%arg0: i32) -> (i32, i32) {
    %c0_i32 = arith.constant 0 : i32
    %c0_i32_0 = arith.constant 0 : i32
    return %arg0, %c0_i32 : i32, i32
  }
}

</mosaic_0001>

<bundles_post_ra>
// kernel: tpu_custom_call.1
= control target key start
LH: loop header
LB: loop body
LE: loop exit
PB: predicated region body
PF: predicated region fallthrough
CT: control target
= control target key end

     0   :  { %6 = vsyncpa [#allocation3], 0  ;;  %s128_s0 = inlined_call_operand.hbm [shape: f32[1,512], index: 0, kind: input, shape index: {}, may-alias: {0,1}]   ;;  %s129_s1 = inlined_call_operand.hbm [shape: f32[1,512], index: 1, kind: output, shape index: {}, may-alias: {0,1}]  }
   0x1   :  { %7 = vsyncpa [#allocation4], 0  ;;  %s92_s6 = smov [#allocation2]   ;;  %s44_s10 = scalar_lea.hbm %s128_s0, 64 }
   0x2   :  { %s14_s7 = sshll.u32 %s92_s6, 4  ;;  %p45_p0 = scmp.ne.s32.totalorder %s128_s0, %s44_s10  ;;  %s15_s7 = int_to_ptr.vmem [resolvable:$true] %s14_s7 }
   0x3   :  { %p48_p1 = scmp.lt.u32.totalorder %s44_s10, %s128_s0 }
   0x5   :  { %p50_p2 = pnand %p48_p1, %p45_p0 }
   0x7   :  { %53 = shalt.err (!%p50_p2)
}
   0x8   :  { %s54_s15 = scalar_lea.vmem %s15_s7, 64  ;;  %p59_p4 = scmp.lt.s32.totalorder %s15_s7, %s15_s7 }
   0x9   :  { %p55_p3 = scmp.ne.s32.totalorder %s15_s7, %s54_s15  ;;  %p60_p5 = scmp.lt.s32.totalorder %s54_s15, %s54_s15 }
   0xb   :  { %p61_p6 = por %p60_p5, %p59_p4 }
   0xd   :  { %p62_p7 = pnand %p61_p6, %p55_p3 }
   0xf   :  { %65 = shalt.err (!%p62_p7)
}
  0x10   :  { %17 = dma.hbm_to_vmem [thread:$0]  %s128_s0, 64, %s15_s7, [#allocation3]  }
  0x11   :  { %88 = dma.done.wait [#allocation3], 64  }
  0x12   :  { %89 = vsyncadd [#allocation3], 4294967232  ;;  %v22_v0 = vlaneseq  ;;  %s93_s18 = smov [#allocation5]   ;;  %v21_v1 = vld [vmem:[#allocation2] sm:$0xf] }
  0x13   :  { %s33_s19 = sshll.u32 %s93_s18, 4  ;;  %s34_s19 = int_to_ptr.vmem [resolvable:$true] %s33_s19 }
  0x14   :  { %vm24_vm0 = vcmp.lt.s32.totalorder %v22_v0, 512  ;;  %s66_s20 = scalar_lea.vmem %s34_s19, 64  ;;  %p71_p9 = scmp.lt.s32.totalorder %s34_s19, %s34_s19 }
  0x15   :  { %26 = vst.msk [vmem:[#allocation5] sm:$0xf] %vm24_vm0, %v21_v1  ;;  %p67_p8 = scmp.ne.s32.totalorder %s34_s19, %s66_s20  ;;  %p72_p10 = scmp.lt.s32.totalorder %s66_s20, %s66_s20 }
  0x17   :  { %p73_p11 = por %p72_p10, %p71_p9 }
  0x19   :  { %p74_p12 = pnand %p73_p11, %p67_p8 }
  0x1b   :  { %77 = shalt.err (!%p74_p12)
}
  0x1c   :  { %s78_s0 = scalar_lea.hbm %s129_s1, 64 }
  0x1d   :  { %p79_p13 = scmp.ne.s32.totalorder %s129_s1, %s78_s0  ;;  %p82_p0 = scmp.lt.u32.totalorder %s78_s0, %s129_s1 }
  0x1f   :  { %p84_p1 = pnand %p82_p0, %p79_p13 }
  0x21   :  { %87 = shalt.err (!%p84_p1)
}
  0x22   :  { %36 = dma.vmem_to_hbm [thread:$0]  %s34_s19, 64, %s129_s1, [#allocation4]  }
  0x23   :  { %90 = dma.done.wait [#allocation4], 64  }
  0x24   :  { %91 = vsyncadd [#allocation4], 4294967232 }
  0x25   :  { %40 = vsyncpa [#allocation3], 1 }
  0x26   :  { %41 = vsyncpa [#allocation4], 1 }

</bundles_post_ra>
